<compile_context>
chip_gen: v7x
topology: tpu7x:2x2x1
jax: 0.10.0
libtpu: 0.0.40
codegen_flags: <defaults>
</compile_context>

<pallas_src>
import functools
import math

import jax
import jax.numpy as jnp
from jax.experimental import pallas as pl
from jax.experimental.pallas import tpu as pltpu

# Double-buffered per-step VMEM footprint cap (conservative for v7x: 64 MiB
# physical / 32 MiB scoped default). vmem_limit leaves headroom above it.
_VMEM_BLOCK_BUDGET = 24 * 1024 * 1024
_VMEM_LIMIT_BYTES = 48 * 1024 * 1024


def _mpcat_kernel(cx, compute_dtype, scales_ref, x_ref, y_ref, o_ref):
    # scales_ref: SMEM (2,) f32 = [scale*scalex, scale*scaley]
    # x_ref: (bt, Cx, ts), y_ref: (bt, Cy, ts), o_ref: (bt, Cx+Cy, ts) VMEM tiles
    sx = scales_ref[0].astype(compute_dtype)
    sy = scales_ref[1].astype(compute_dtype)
    o_ref[:, :cx, :] = (x_ref[...].astype(compute_dtype) * sx).astype(o_ref.dtype)
    o_ref[:, cx:, :] = (y_ref[...].astype(compute_dtype) * sy).astype(o_ref.dtype)


def _round_up(n, m):
    return ((n + m - 1) // m) * m


def _choose_blocks(b, cx, cy, s, x_bytes, y_bytes, o_bytes):
    """Return (bt, ts, s_pad): batch block, spatial tile, padded spatial extent."""
    c_total = cx + cy
    per_col = cx * x_bytes + cy * y_bytes + c_total * o_bytes  # bytes per (*,1) column

    def footprint(bt, ts):
        return 2 * bt * ts * per_col  # x2: double buffering of in+out blocks

    # Preferred: full spatial extent per step (fully contiguous DMA runs per
    # batch row), growing the batch block so each grid step moves multiple MB.
    if footprint(1, s) <= _VMEM_BLOCK_BUDGET:
        bt = 1
        for cand in range(b, 0, -1):
            if b % cand == 0 and footprint(cand, s) <= _VMEM_BLOCK_BUDGET:
                bt = cand
                break
        return bt, s, s

    # Fallback: a full row is too large -> split S into lane-dense tiles
    # (multiples of 128) of the padded extent so stores stay unmasked.
    s_pad = _round_up(s, 128)
    n128 = s_pad // 128
    ts = 128
    for k in range(n128, 0, -1):
        if n128 % k == 0 and footprint(1, k * 128) <= _VMEM_BLOCK_BUDGET:
            ts = k * 128
            break
    return 1, ts, s_pad


def mp_cat(x, y, t=0.5):
    """Pallas TPU MPCat: x (B, Cx, *sp), y (B, Cy, *sp) -> (B, Cx+Cy, *sp)."""
    if x.shape[0] != y.shape[0] or x.shape[2:] != y.shape[2:]:
        raise ValueError("x and y must agree on all dims except dim 1")
    b = x.shape[0]
    cx, cy = x.shape[1], y.shape[1]
    c_total = cx + cy
    spatial = x.shape[2:]
    s = int(math.prod(spatial)) if spatial else 1

    nx, ny = int(x.size), int(y.size)
    # Scales computed outside the kernel with jnp ops so a traced `t` also works
    # (no recompiles / no failures under jit with t as an argument).
    t_arr = jnp.asarray(t, dtype=jnp.float32)
    scalex = (1.0 - t_arr) * (1.0 / math.sqrt(nx))
    scaley = t_arr * (1.0 / math.sqrt(ny))
    scale = jnp.sqrt((nx + ny) / ((1.0 - t_arr) ** 2 + t_arr ** 2))
    scales = jnp.stack([scale * scalex, scale * scaley]).astype(jnp.float32)

    out_dtype = jnp.result_type(x.dtype, y.dtype)
    # bf16/fp8 inputs: multiply natively (v6e/v7x VPU handles bf16); keep f32
    # compute whenever the output is f32 (also the right thing on v5e).
    compute_dtype = jnp.float32 if out_dtype == jnp.float32 else out_dtype

    x3 = x.reshape(b, cx, s)
    y3 = y.reshape(b, cy, s)

    x_bytes = jnp.dtype(x.dtype).itemsize
    y_bytes = jnp.dtype(y.dtype).itemsize
    o_bytes = jnp.dtype(out_dtype).itemsize
    bt, ts, s_pad = _choose_blocks(b, cx, cy, s, x_bytes, y_bytes, o_bytes)

    if s_pad != s:
        # Rare path: large, non-128-aligned S that must be split. Pad once so
        # every tile/store stays lane-dense; slice the output back afterwards.
        x3 = jnp.pad(x3, ((0, 0), (0, 0), (0, s_pad - s)))
        y3 = jnp.pad(y3, ((0, 0), (0, 0), (0, s_pad - s)))

    nb, ns = b // bt, s_pad // ts

    # Put the longer grid axis first so a megacore / 2-TC split stays balanced.
    if ns > nb:
        grid = (ns, nb)
        bmap = lambda j, i: (i, 0, j)
    else:
        grid = (nb, ns)
        bmap = lambda i, j: (i, 0, j)

    cost = pl.CostEstimate(
        flops=nx + ny,
        transcendentals=0,
        bytes_accessed=nx * x_bytes + ny * y_bytes + (nx + ny) * o_bytes,
    )

    out = pl.pallas_call(
        functools.partial(_mpcat_kernel, cx, compute_dtype),
        out_shape=jax.ShapeDtypeStruct((b, c_total, s_pad), out_dtype),
        grid=grid,
        in_specs=[
            pl.BlockSpec(memory_space=pltpu.MemorySpace.SMEM),   # scales (2,)
            pl.BlockSpec((bt, cx, ts), bmap),                    # x tile
            pl.BlockSpec((bt, cy, ts), bmap),                    # y tile
        ],
        out_specs=pl.BlockSpec((bt, c_total, ts), bmap),
        compiler_params=pltpu.CompilerParams(
            dimension_semantics=("parallel", "parallel"),
            vmem_limit_bytes=_VMEM_LIMIT_BYTES),
        cost_estimate=cost,
    )(scales, x3, y3)

    if s_pad != s:
        out = out[:, :, :s]
    return out.reshape(b, c_total, *spatial)


def _reference(x, y, t=0.5):
    # pure-JAX reference of the torch forward
    nx, ny = int(x.size), int(y.size)
    scalex = (1.0 - t) / math.sqrt(nx)
    scaley = t / math.sqrt(ny)
    scale = math.sqrt((nx + ny) / ((1.0 - t) ** 2 + t ** 2))
    return scale * jnp.concatenate([scalex * x, scaley * y], axis=1)


if __name__ == "__main__":
    key = jax.random.PRNGKey(0)
    kx, ky = jax.random.split(key)

    # small shapes consistent with a diffusion-UNet concat: (B, C, H, W)
    x = jax.random.normal(kx, (2, 4, 16, 16), dtype=jnp.float32)
    y = jax.random.normal(ky, (2, 8, 16, 16), dtype=jnp.float32)

    out = mp_cat(x, y, t=0.5)
    out = jax.block_until_ready(out)

    ref = _reference(x, y, t=0.5)
    assert out.shape == (2, 12, 16, 16)
    assert jnp.allclose(out, ref, atol=1e-6, rtol=1e-6), float(
        jnp.max(jnp.abs(out - ref)))

    print("KERNEL_OK")
</pallas_src>

<mosaic_0001>
module attributes {stable_mosaic.version = 11 : i64} {
  func.func @_mpcat_kernel(%arg0: i32, %arg1: i32, %arg2: memref<2xf32, #tpu.memory_space<smem>>, %arg3: memref<2x4x256xf32, #tpu.memory_space<vmem>>, %arg4: memref<2x8x256xf32, #tpu.memory_space<vmem>>, %arg5: memref<2x12x256xf32, #tpu.memory_space<vmem>>) attributes {dimension_semantics = [#tpu.dimension_semantics<parallel>, #tpu.dimension_semantics<parallel>], iteration_bounds = array<i64: 1, 1>, scalar_prefetch = 0 : i64, scratch_operands = 0 : i64, tpu.core_type = #tpu.core_type<tc>, window_params = [{transform_indices = @transform_0, window_bounds = array<i64: 2>}, {transform_indices = @transform_1, window_bounds = array<i64: 2, 4, 256>}, {transform_indices = @transform_2, window_bounds = array<i64: 2, 8, 256>}, {transform_indices = @transform_3, window_bounds = array<i64: 2, 12, 256>}]} {
    %c0 = arith.constant 0 : index
    %0 = memref.load %arg2[%c0] : memref<2xf32, #tpu.memory_space<smem>>
    %c1 = arith.constant 1 : index
    %1 = memref.load %arg2[%c1] : memref<2xf32, #tpu.memory_space<smem>>
    %c0_0 = arith.constant 0 : index
    %c0_1 = arith.constant 0 : index
    %c0_2 = arith.constant 0 : index
    %2 = vector.load %arg3[%c0_0, %c0_1, %c0_2] : memref<2x4x256xf32, #tpu.memory_space<vmem>>, vector<2x4x256xf32>
    %3 = vector.broadcast %0 : f32 to vector<2x4x256xf32>
    %4 = arith.mulf %2, %3 : vector<2x4x256xf32>
    %c0_3 = arith.constant 0 : index
    %c0_4 = arith.constant 0 : index
    %c0_5 = arith.constant 0 : index
    %5 = vector.load %arg5[%c0_3, %c0_4, %c0_5] : memref<2x12x256xf32, #tpu.memory_space<vmem>>, vector<2x4x256xf32>
    tpu.vector_store %arg5[%c0_3, %c0_4, %c0_5], %4 {strides = array<i32>} : memref<2x12x256xf32, #tpu.memory_space<vmem>>, vector<2x4x256xf32>,
    %c0_6 = arith.constant 0 : index
    %c0_7 = arith.constant 0 : index
    %c0_8 = arith.constant 0 : index
    %6 = vector.load %arg4[%c0_6, %c0_7, %c0_8] : memref<2x8x256xf32, #tpu.memory_space<vmem>>, vector<2x8x256xf32>
    %7 = vector.broadcast %1 : f32 to vector<2x8x256xf32>
    %8 = arith.mulf %6, %7 : vector<2x8x256xf32>
    %c0_9 = arith.constant 0 : index
    %c4 = arith.constant 4 : index
    %c0_10 = arith.constant 0 : index
    %9 = vector.load %arg5[%c0_9, %c4, %c0_10] : memref<2x12x256xf32, #tpu.memory_space<vmem>>, vector<2x8x256xf32>
    tpu.vector_store %arg5[%c0_9, %c4, %c0_10], %8 {strides = array<i32>} : memref<2x12x256xf32, #tpu.memory_space<vmem>>, vector<2x8x256xf32>,
    return
  }
  func.func @transform_0(%arg0: i32, %arg1: i32) -> i32 {
    %c0_i32 = arith.constant 0 : i32
    %c0_i32_0 = arith.constant 0 : i32
    return %c0_i32 : i32
  }
  func.func @transform_1(%arg0: i32, %arg1: i32) -> (i32, i32, i32) {
    %c0_i32 = arith.constant 0 : i32
    %c0_i32_0 = arith.constant 0 : i32
    return %arg0, %c0_i32, %arg1 : i32, i32, i32
  }
  func.func @transform_2(%arg0: i32, %arg1: i32) -> (i32, i32, i32) {
    %c0_i32 = arith.constant 0 : i32
    %c0_i32_0 = arith.constant 0 : i32
    return %arg0, %c0_i32, %arg1 : i32, i32, i32
  }
  func.func @transform_3(%arg0: i32, %arg1: i32) -> (i32, i32, i32) {
    %c0_i32 = arith.constant 0 : i32
    %c0_i32_0 = arith.constant 0 : i32
    return %arg0, %c0_i32, %arg1 : i32, i32, i32
  }
}

</mosaic_0001>

<bundles_post_ra>
// kernel: tpu_custom_call.1
= control target key start
LH: loop header
LB: loop body
LE: loop exit
PB: predicated region body
PF: predicated region fallthrough
CT: control target
= control target key end

     0   :  { %8 = vsyncpa [#allocation4], 0  ;;  %s261_s0 = inlined_call_operand.hbm [shape: f32[2], index: 0, kind: input, shape index: {}]   ;;  %s262_s1 = inlined_call_operand.hbm [shape: f32[2,4,256], index: 1, kind: input, shape index: {}]   ;;  %s263_s2 = inlined_call_operand.hbm [shape: f32[2,8,256], index: 2, kind: input, shape index: {}]   ;;  %s264_s3 = inlined_call_operand.vmem [shape: f32[2,12,256], index: 3, kind: output, shape index: {}]  }
   0x1   :  { %9 = vsyncpa [#allocation3], 0 }
   0x2   :  { %10 = vsyncpa [#allocation7], 0  ;;  %s114_s14 = scalar_lea.hbm %s261_s0, 16 }
   0x3   :  { %p115_p0 = scmp.ne.s32.totalorder %s261_s0, %s114_s14  ;;  %p118_p1 = scmp.lt.u32.totalorder %s114_s14, %s261_s0 }
   0x5   :  { %p120_p2 = pnand %p118_p1, %p115_p0 }
   0x7   :  { %123 = shalt.err (!%p120_p2)
}
   0x8   :  { %s174_s19 = smov [#allocation2]   ;;  %s175_s22 = smov [#allocation5]  }
   0x9   :  { %18 = dma.hbm_to_smem %s261_s0, 16, %s174_s19, [#allocation4]  }
   0xa   :  { %s24_s23 = sshll.u32 %s175_s22, 4  ;;  %s124_s26 = scalar_lea.hbm %s262_s1, 256  ;;  %s25_s23 = int_to_ptr.vmem [resolvable:$true] %s24_s23 }
   0xb   :  { %p125_p3 = scmp.ne.s32.totalorder %s262_s1, %s124_s26  ;;  %p128_p4 = scmp.lt.u32.totalorder %s124_s26, %s262_s1 }
   0xd   :  { %p130_p5 = pnand %p128_p4, %p125_p3 }
   0xf   :  { %133 = shalt.err (!%p130_p5)
}
  0x10   :  { %s134_s4 = scalar_lea.vmem %s25_s23, 256  ;;  %p139_p7 = scmp.lt.s32.totalorder %s25_s23, %s25_s23 }
  0x11   :  { %p135_p6 = scmp.ne.s32.totalorder %s25_s23, %s134_s4  ;;  %p140_p8 = scmp.lt.s32.totalorder %s134_s4, %s134_s4 }
  0x13   :  { %p141_p9 = por %p140_p8, %p139_p7 }
  0x15   :  { %p142_p10 = pnand %p141_p9, %p135_p6 }
  0x17   :  { %145 = shalt.err (!%p142_p10)
}
  0x18   :  { %s176_s0 = smov 128   ;;  %s177_s5 = smov 8  }
  0x19   :  { %30 = dma.hbm_to_vmem [thread:$0]  %s262_s1, 256, %s25_s23, [#allocation3], %s176_s0, %s176_s0, %s177_s5  }
  0x1a   :  { %s178_s8 = smov [#allocation6]   ;;  %s146_s12 = scalar_lea.hbm %s263_s2, 512 }
  0x1b   :  { %s36_s9 = sshll.u32 %s178_s8, 4  ;;  %p147_p11 = scmp.ne.s32.totalorder %s263_s2, %s146_s12  ;;  %s37_s9 = int_to_ptr.vmem [resolvable:$true] %s36_s9 }
  0x1c   :  { %p150_p12 = scmp.lt.u32.totalorder %s146_s12, %s263_s2 }
  0x1e   :  { %p152_p13 = pnand %p150_p12, %p147_p11 }
  0x20   :  { %155 = shalt.err (!%p152_p13)
}
  0x21   :  { %s156_s17 = scalar_lea.vmem %s37_s9, 512  ;;  %p161_p1 = scmp.lt.s32.totalorder %s37_s9, %s37_s9 }
  0x22   :  { %p157_p0 = scmp.ne.s32.totalorder %s37_s9, %s156_s17  ;;  %p162_p2 = scmp.lt.s32.totalorder %s156_s17, %s156_s17 }
  0x24   :  { %p163_p3 = por %p162_p2, %p161_p1 }
  0x26   :  { %p164_p4 = pnand %p163_p3, %p157_p0 }
  0x28   :  { %167 = shalt.err (!%p164_p4)
}
  0x29   :  { %s179_s1 = smov 256   ;;  %s180_s18 = smov 16  }
  0x2a   :  { %42 = dma.hbm_to_vmem [thread:$0]  %s263_s2, 512, %s37_s9, [#allocation7], %s179_s1, %s179_s1, %s180_s18  }
  0x2b   :  { %168 = dma.done.wait [#allocation4], 16  }
  0x2c   :  { %169 = vsyncadd [#allocation4], 4294967280 }
  0x2d   :  { %170 = dma.done.wait [#allocation3], 256  }
  0x2e   :  { %171 = vsyncadd [#allocation3], 4294967040 }
  0x2f   :  { %172 = dma.done.wait [#allocation7], 512  }
  0x30   :  { %173 = vsyncadd [#allocation7], 4294966784 }
  0x31   :  { %52 = sfence }
  0x32   :  { %s53_s21 = sld [smem:[#allocation2]]  ;;  %s106_s22 = sld [smem:[#allocation2 + $0x1]]  ;;  %v55_v0 = vld [vmem:[#allocation5] sm:$0xff]  ;;  %v56_v1 = vld [vmem:[#allocation5 + $0x8] sm:$0xff]  ;;  %v70_v2 = vld [vmem:[#allocation6] sm:$0xff] }
  0x33   :  { %v71_v3 = vld [vmem:[#allocation6 + $0x8] sm:$0xff]  ;;  %v72_v4 = vld [vmem:[#allocation6 + $0x10] sm:$0xff]  ;;  %v73_v5 = vld [vmem:[#allocation6 + $0x18] sm:$0xff] }
  0x38   :  { %v57_v6 = vstv %s53_s21  ;;  %v74_v7 = vstv %s106_s22 }
  0x39   :  { %v58_v8 = vmul.f32 %v57_v6, %v55_v0  ;;  %v59_v9 = vmul.f32 %v57_v6, %v56_v1  ;;  %v75_v10 = vmul.f32 %v74_v7, %v70_v2  ;;  %v76_v11 = vmul.f32 %v74_v7, %v71_v3 }
  0x3a   :  { %v77_v12 = vmul.f32 %v74_v7, %v72_v4  ;;  %v78_v13 = vmul.f32 %v74_v7, %v73_v5 }
  0x3b   :  { %66 = vst [vmem:[%s264_s3] sm:$0xf] %v58_v8  ;;  %v62_v14 = vcombine.high %v58_v8, %v58_v8  ;;  %68 = vst [vmem:[%s264_s3 + $0x20] sm:$0xf] %v59_v9  ;;  %v63_v15 = vcombine.high %v59_v9, %v59_v9  ;;  %v83_v16 = vrot.slane %v75_v10, 4  ;;  %v84_v17 = vrot.slane %v76_v11, 4 }
  0x3c   :  { %v85_v18 = vrot.slane %v77_v12, 4  ;;  %v86_v19 = vrot.slane %v78_v13, 4 }
  0x3d   :  { %67 = vst [vmem:[%s264_s3 + $0x8] sm:$0xf] %v62_v14  ;;  %69 = vst [vmem:[%s264_s3 + $0x28] sm:$0xf] %v63_v15 }
  0x3e   :  { %91 = vst [vmem:[%s264_s3 + $0x10] ss:$-12 sps:$4 sm:$0xff] %v83_v16   ;;  %92 = vst [vmem:[%s264_s3 + $0x18] ss:$-12 sps:$4 sm:$0xff] %v84_v17  }
  0x3f   :  { %95 = vst [vmem:[%s264_s3 + $0x30] ss:$-12 sps:$4 sm:$0xff] %v85_v18   ;;  %96 = vst [vmem:[%s264_s3 + $0x38] ss:$-12 sps:$4 sm:$0xff] %v86_v19  }
  0x40   :  { %103 = vsyncpa [#allocation3], 1 }
  0x41   :  { %104 = vsyncpa [#allocation7], 1 }
  0x42   :  { %105 = vsyncpa [#allocation4], 1 }

</bundles_post_ra>
